<compile_context>
chip_gen: v7x
topology: tpu7x:2x2x1
jax: 0.10.0
libtpu: 0.0.40
codegen_flags: <defaults>
</compile_context>

<pallas_src>
import functools

import jax
import jax.numpy as jnp
from jax.experimental import pallas as pl
from jax.experimental.pallas import tpu as pltpu

F_IN = 16            # per-user raw feature dim (synthetic UserEncoder input)
E_DIM = 32           # per-user embedding dim (concat -> 64, matches Linear(64, inner))
CAT_IN = 2 * F_IN    # 32 : [xa | xb] lane-concatenated raw features
CAT_E = 2 * E_DIM    # 64 : [ua | ub]
INNER = 150          # predictor hidden width ("inner" in the PyTorch module)
INNER_PAD = 256      # lane-padded hidden width (zero-padded weights/params)
BN_EPS = 1e-5
MAX_TILE = 1024      # batch tile rows (multiple of 8), pipelined over the grid


def _round_up(x, m):
    return ((x + m - 1) // m) * m


def _fused_kernel(
    x_ref,                 # (tb, 32)  f32  [xa | xb] raw features
    we_ref, be_ref,        # (32, 64)  bf16 block-diag encoder weight, (1, 64) f32 bias
    w1_ref, b1_ref,        # (64, 256) bf16, (1, 256) f32
    gamma_ref, beta_ref,   # (1, 256)  f32 BatchNorm affine
    w2_ref, b2_ref,        # (1, 256)  f32 (= w2.T padded), (1, 1) f32
    out_ref,               # (tb, 1)   f32 probabilities (written in phase 1 only)
    fsum_sc, fsq_sc,       # (1, 256)  f32 global stats accumulators (VMEM scratch)
    w2eff_sc, b2eff_sc,    # (1, 256) / (1, 1) f32 folded projection (VMEM scratch)
    *, batch_rows, rows_in_last, masked,
):
    phase = pl.program_id(0)
    i = pl.program_id(1)
    last = pl.num_programs(1) - 1

    @pl.when(jnp.logical_and(phase == 0, i == 0))
    def _init():
        fsum_sc[...] = jnp.zeros_like(fsum_sc)
        fsq_sc[...] = jnp.zeros_like(fsq_sc)

    # --- recompute hidden activations for this batch tile (both phases) ------
    # One block-diagonal encoder dot yields [ua | ub] directly (no lane concat).
    u = jnp.maximum(
        jnp.dot(x_ref[...].astype(jnp.bfloat16), we_ref[...],
                preferred_element_type=jnp.float32) + be_ref[...], 0.0)   # (tb, 64)
    h = jnp.maximum(
        jnp.dot(u.astype(jnp.bfloat16), w1_ref[...],
                preferred_element_type=jnp.float32) + b1_ref[...], 0.0)   # (tb, 256)

    # --- phase 0: accumulate global (training-mode) BatchNorm statistics -----
    @pl.when(phase == 0)
    def _stats():
        def _acc(hm):
            fsum_sc[...] += jnp.sum(hm, axis=0, keepdims=True)
            fsq_sc[...] += jnp.sum(hm * hm, axis=0, keepdims=True)

        if masked:  # only traced when the batch was padded to the tile size
            @pl.when(i < last)
            def _full():
                _acc(h)

            @pl.when(i == last)
            def _tail():
                rows = jax.lax.broadcasted_iota(jnp.int32, (h.shape[0], 1), 0)
                _acc(jnp.where(rows < rows_in_last, h, 0.0))
        else:
            _acc(h)

    # --- phase boundary: fold BatchNorm into the final 150->1 projection -----
    @pl.when(jnp.logical_and(phase == 1, i == 0))
    def _fold_bn():
        denom = jnp.float32(batch_rows)
        mean = fsum_sc[...] / denom
        var = jnp.maximum(fsq_sc[...] / denom - mean * mean, 0.0)
        scale = gamma_ref[...] * jax.lax.rsqrt(var + BN_EPS)          # (1, 256)
        w2eff_sc[...] = w2_ref[...] * scale
        b2eff_sc[...] = b2_ref[...] + jnp.sum(
            (beta_ref[...] - mean * scale) * w2_ref[...], axis=-1, keepdims=True)

    # --- phase 1: project + sigmoid (VPU multiply + XLU lane reduction) ------
    @pl.when(phase == 1)
    def _project():
        logits = jnp.sum(h * w2eff_sc[...], axis=-1, keepdims=True) + b2eff_sc[...]
        out_ref[...] = jax.nn.sigmoid(logits)


def match_predictor(user_a_input, user_b_input, params):
    """Full MatchPredictor forward pass as one fused, batch-tiled Pallas kernel.

    user_a_input, user_b_input : (B, F_IN) float32 raw user features.
    Returns (B, 1) float32 match probabilities.
    """
    B = user_a_input.shape[0]
    tb = min(MAX_TILE, _round_up(B, 8))
    b_pad = _round_up(B, tb)
    n_tiles = b_pad // tb
    masked = b_pad != B
    rows_in_last = B - (n_tiles - 1) * tb

    # Lane-concat the two users' raw features into one input stream.
    x = jnp.concatenate([user_a_input, user_b_input], axis=1)        # (B, 32)
    if masked:
        x = jnp.pad(x, ((0, b_pad - B), (0, 0)))

    # Parameter prep: block-diag encoder weight, lane-padded hidden params.
    pad_i = ((0, 0), (0, INNER_PAD - INNER))
    we = params["we"]
    z = jnp.zeros_like(we)
    we_bd = jnp.concatenate(
        [jnp.concatenate([we, z], axis=1),
         jnp.concatenate([z, we], axis=1)], axis=0).astype(jnp.bfloat16)  # (32, 64)
    be2 = jnp.concatenate([params["be"], params["be"]], axis=1)          # (1, 64)
    w1 = jnp.pad(params["w1"], pad_i).astype(jnp.bfloat16)               # (64, 256)
    b1 = jnp.pad(params["b1"], pad_i)
    gamma = jnp.pad(params["gamma"], pad_i)
    beta = jnp.pad(params["beta"], pad_i)
    w2_row = jnp.pad(params["w2"].T, pad_i)                              # (1, 256)
    b2 = params["b2"]                                                    # (1, 1)

    kernel = functools.partial(_fused_kernel, batch_rows=B,
                               rows_in_last=rows_in_last, masked=masked)
    const = lambda p, i: (0, 0)

    out = pl.pallas_call(
        kernel,
        out_shape=jax.ShapeDtypeStruct((b_pad, 1), jnp.float32),
        grid=(2, n_tiles),                    # (phase, batch tile)
        in_specs=[
            pl.BlockSpec((tb, CAT_IN), lambda p, i: (i, 0)),   # x
            pl.BlockSpec((CAT_IN, CAT_E), const),              # we_bd
            pl.BlockSpec((1, CAT_E), const),                   # be2
            pl.BlockSpec((CAT_E, INNER_PAD), const),           # w1
            pl.BlockSpec((1, INNER_PAD), const),               # b1
            pl.BlockSpec((1, INNER_PAD), const),               # gamma
            pl.BlockSpec((1, INNER_PAD), const),               # beta
            pl.BlockSpec((1, INNER_PAD), const),               # w2 row
            pl.BlockSpec((1, 1), const),                       # b2
        ],
        out_specs=pl.BlockSpec((tb, 1), lambda p, i: (i, 0)),
        scratch_shapes=[
            pltpu.VMEM((1, INNER_PAD), jnp.float32),   # fsum
            pltpu.VMEM((1, INNER_PAD), jnp.float32),   # fsq
            pltpu.VMEM((1, INNER_PAD), jnp.float32),   # w2_eff
            pltpu.VMEM((1, 1), jnp.float32),           # b2_eff
        ],
        compiler_params=pltpu.CompilerParams(
            # phase axis and the cross-tile stats reduction are sequential
            dimension_semantics=("arbitrary", "arbitrary")),
    )(x, we_bd, be2, w1, b1, gamma, beta, w2_row, b2)

    return out[:B]


def init_params(key):
    """Deterministic synthetic parameter init (shapes from the module __init__).

    Weights are stored (in, out) so the kernel computes y = x @ W + b.
    """
    ks = jax.random.split(key, 6)
    scale = 0.1
    return {
        # synthesized UserEncoder: Linear(F_IN, 32)
        "we": scale * jax.random.normal(ks[0], (F_IN, E_DIM), jnp.float32),
        "be": scale * jax.random.normal(ks[1], (1, E_DIM), jnp.float32),
        # predictor[0]: Linear(64, 150)
        "w1": scale * jax.random.normal(ks[2], (2 * E_DIM, INNER), jnp.float32),
        "b1": scale * jax.random.normal(ks[3], (1, INNER), jnp.float32),
        # predictor[2]: BatchNorm1d(150) affine params (fresh init: gamma=1, beta=0)
        "gamma": jnp.ones((1, INNER), jnp.float32),
        "beta": jnp.zeros((1, INNER), jnp.float32),
        # predictor[3]: Linear(150, 1)
        "w2": scale * jax.random.normal(ks[4], (INNER, 1), jnp.float32),
        "b2": scale * jax.random.normal(ks[5], (1, 1), jnp.float32),
    }


def _reference(xa, xb, p, matmul_dtype=jnp.float32):
    """Plain-JAX reference; matmul_dtype mirrors the kernel's bf16 MXU operands."""
    md = matmul_dtype

    def dot(a, b):
        return jnp.dot(a.astype(md), b.astype(md), preferred_element_type=jnp.float32)

    ua = jnp.maximum(dot(xa, p["we"]) + p["be"], 0.0)
    ub = jnp.maximum(dot(xb, p["we"]) + p["be"], 0.0)
    c = jnp.concatenate([ua, ub], axis=1)
    h = jnp.maximum(dot(c, p["w1"]) + p["b1"], 0.0)
    mean = jnp.mean(h, axis=0, keepdims=True)
    var = jnp.mean((h - mean) ** 2, axis=0, keepdims=True)
    hbn = (h - mean) * jax.lax.rsqrt(var + BN_EPS) * p["gamma"] + p["beta"]
    return jax.nn.sigmoid(hbn @ p["w2"] + p["b2"])


if __name__ == "__main__":
    key = jax.random.PRNGKey(0)
    k_params, k_a, k_b = jax.random.split(key, 3)

    B = 8  # batch of user pairs
    params = init_params(k_params)
    user_a_input = jax.random.normal(k_a, (B, F_IN), jnp.float32)
    user_b_input = jax.random.normal(k_b, (B, F_IN), jnp.float32)

    out = jax.jit(match_predictor)(user_a_input, user_b_input, params)
    out = jax.block_until_ready(out)
    assert out.shape == (B, 1), out.shape

    # Exact-math check: reference performs the same bf16-operand / f32-accumulate matmuls.
    ref_bf16 = _reference(user_a_input, user_b_input, params, matmul_dtype=jnp.bfloat16)
    assert jnp.allclose(out, ref_bf16, atol=1e-3, rtol=1e-3), "mismatch vs bf16 reference"

    # Semantic check against the full-f32 PyTorch-equivalent math (loose: bf16 rounding).
    ref_f32 = _reference(user_a_input, user_b_input, params, matmul_dtype=jnp.float32)
    assert jnp.allclose(out, ref_f32, atol=2e-2, rtol=2e-2), "mismatch vs f32 reference"

    print("KERNEL_OK")
</pallas_src>

<mosaic_0001>
module attributes {stable_mosaic.version = 11 : i64} {
  func.func @_fused_kernel(%arg0: i32, %arg1: i32, %arg2: memref<8x32xf32, #tpu.memory_space<vmem>>, %arg3: memref<32x64xbf16, #tpu.memory_space<vmem>>, %arg4: memref<1x64xf32, #tpu.memory_space<vmem>>, %arg5: memref<64x256xbf16, #tpu.memory_space<vmem>>, %arg6: memref<1x256xf32, #tpu.memory_space<vmem>>, %arg7: memref<1x256xf32, #tpu.memory_space<vmem>>, %arg8: memref<1x256xf32, #tpu.memory_space<vmem>>, %arg9: memref<1x256xf32, #tpu.memory_space<vmem>>, %arg10: memref<1x1xf32, #tpu.memory_space<vmem>>, %arg11: memref<8x1xf32, #tpu.memory_space<vmem>>, %arg12: memref<1x256xf32, #tpu.memory_space<vmem>>, %arg13: memref<1x256xf32, #tpu.memory_space<vmem>>, %arg14: memref<1x256xf32, #tpu.memory_space<vmem>>, %arg15: memref<1x1xf32, #tpu.memory_space<vmem>>) attributes {dimension_semantics = [#tpu.dimension_semantics<arbitrary>, #tpu.dimension_semantics<arbitrary>], iteration_bounds = array<i64: 2, 1>, scalar_prefetch = 0 : i64, scratch_operands = 4 : i64, tpu.core_type = #tpu.core_type<tc>, window_params = [{transform_indices = @transform_0, window_bounds = array<i64: 8, 32>}, {pipeline_mode = #tpu.pipeline_mode<synchronous>, transform_indices = @transform_1, window_bounds = array<i64: 32, 64>}, {pipeline_mode = #tpu.pipeline_mode<synchronous>, transform_indices = @transform_2, window_bounds = array<i64: 1, 64>}, {pipeline_mode = #tpu.pipeline_mode<synchronous>, transform_indices = @transform_3, window_bounds = array<i64: 64, 256>}, {pipeline_mode = #tpu.pipeline_mode<synchronous>, transform_indices = @transform_4, window_bounds = array<i64: 1, 256>}, {pipeline_mode = #tpu.pipeline_mode<synchronous>, transform_indices = @transform_5, window_bounds = array<i64: 1, 256>}, {pipeline_mode = #tpu.pipeline_mode<synchronous>, transform_indices = @transform_6, window_bounds = array<i64: 1, 256>}, {pipeline_mode = #tpu.pipeline_mode<synchronous>, transform_indices = @transform_7, window_bounds = array<i64: 1, 256>}, {pipeline_mode = #tpu.pipeline_mode<synchronous>, transform_indices = @transform_8, window_bounds = array<i64: 1, 1>}, {transform_indices = @transform_9, window_bounds = array<i64: 8, 1>}]} {
    %c0_i32 = arith.constant 0 : i32
    %0 = arith.cmpi eq, %arg0, %c0_i32 : i32
    %c0_i32_0 = arith.constant 0 : i32
    %1 = arith.cmpi eq, %arg1, %c0_i32_0 : i32
    %2 = arith.andi %0, %1 : i1
    %3 = arith.extui %2 : i1 to i32
    %c0_i32_1 = arith.constant 0 : i32
    %4 = arith.cmpi ne, %3, %c0_i32_1 : i32
    scf.if %4 {
      %cst_20 = arith.constant 0.000000e+00 : f32
      %33 = vector.broadcast %cst_20 : f32 to vector<1x256xf32>
      %c0_21 = arith.constant 0 : index
      %c0_22 = arith.constant 0 : index
      %34 = vector.load %arg12[%c0_21, %c0_22] : memref<1x256xf32, #tpu.memory_space<vmem>>, vector<1x256xf32>
      tpu.vector_store %arg12[%c0_21, %c0_22], %33 {strides = array<i32>} : memref<1x256xf32, #tpu.memory_space<vmem>>, vector<1x256xf32>,
      %cst_23 = arith.constant 0.000000e+00 : f32
      %35 = vector.broadcast %cst_23 : f32 to vector<1x256xf32>
      %c0_24 = arith.constant 0 : index
      %c0_25 = arith.constant 0 : index
      %36 = vector.load %arg13[%c0_24, %c0_25] : memref<1x256xf32, #tpu.memory_space<vmem>>, vector<1x256xf32>
      tpu.vector_store %arg13[%c0_24, %c0_25], %35 {strides = array<i32>} : memref<1x256xf32, #tpu.memory_space<vmem>>, vector<1x256xf32>,
    } else {
    }
    %c0 = arith.constant 0 : index
    %c0_2 = arith.constant 0 : index
    %5 = vector.load %arg2[%c0, %c0_2] : memref<8x32xf32, #tpu.memory_space<vmem>>, vector<8x32xf32>
    %6 = arith.truncf %5 : vector<8x32xf32> to vector<8x32xbf16>
    %c0_3 = arith.constant 0 : index
    %c0_4 = arith.constant 0 : index
    %7 = vector.load %arg3[%c0_3, %c0_4] : memref<32x64xbf16, #tpu.memory_space<vmem>>, vector<32x64xbf16>
    %cst = arith.constant dense<0.000000e+00> : vector<8x64xf32>
    %8 = tpu.matmul %6, %7, %cst {dimension_numbers = #tpu.dot_dimension_numbers<[1], [0], [0], [1], [0, 0, 1, 1], [], []>} : vector<8x32xbf16>, vector<32x64xbf16>, vector<8x64xf32> -> vector<8x64xf32>
    %c0_5 = arith.constant 0 : index
    %c0_6 = arith.constant 0 : index
    %9 = vector.load %arg4[%c0_5, %c0_6] : memref<1x64xf32, #tpu.memory_space<vmem>>, vector<1x64xf32>
    %10 = vector.broadcast %9 : vector<1x64xf32> to vector<8x64xf32>
    %11 = arith.addf %8, %10 : vector<8x64xf32>
    %cst_7 = arith.constant 0.000000e+00 : f32
    %12 = vector.broadcast %cst_7 : f32 to vector<8x64xf32>
    %13 = arith.maximumf %11, %12 : vector<8x64xf32>
    %14 = arith.truncf %13 : vector<8x64xf32> to vector<8x64xbf16>
    %c0_8 = arith.constant 0 : index
    %c0_9 = arith.constant 0 : index
    %15 = vector.load %arg5[%c0_8, %c0_9] : memref<64x256xbf16, #tpu.memory_space<vmem>>, vector<64x256xbf16>
    %cst_10 = arith.constant dense<0.000000e+00> : vector<8x256xf32>
    %16 = tpu.matmul %14, %15, %cst_10 {dimension_numbers = #tpu.dot_dimension_numbers<[1], [0], [0], [1], [0, 0, 1, 1], [], []>} : vector<8x64xbf16>, vector<64x256xbf16>, vector<8x256xf32> -> vector<8x256xf32>
    %c0_11 = arith.constant 0 : index
    %c0_12 = arith.constant 0 : index
    %17 = vector.load %arg6[%c0_11, %c0_12] : memref<1x256xf32, #tpu.memory_space<vmem>>, vector<1x256xf32>
    %18 = vector.broadcast %17 : vector<1x256xf32> to vector<8x256xf32>
    %19 = arith.addf %16, %18 : vector<8x256xf32>
    %cst_13 = arith.constant 0.000000e+00 : f32
    %20 = vector.broadcast %cst_13 : f32 to vector<8x256xf32>
    %21 = arith.maximumf %19, %20 : vector<8x256xf32>
    %c0_i32_14 = arith.constant 0 : i32
    %22 = arith.cmpi eq, %arg0, %c0_i32_14 : i32
    %23 = arith.extui %22 : i1 to i32
    %c0_i32_15 = arith.constant 0 : i32
    %24 = arith.cmpi ne, %23, %c0_i32_15 : i32
    scf.if %24 {
      %c0_20 = arith.constant 0 : index
      %c0_21 = arith.constant 0 : index
      %33 = vector.load %arg12[%c0_20, %c0_21] : memref<1x256xf32, #tpu.memory_space<vmem>>, vector<1x256xf32>
      %cst_22 = arith.constant dense<0.000000e+00> : vector<256xf32>
      %34 = vector.multi_reduction <add>, %21, %cst_22 [0] : vector<8x256xf32> to vector<256xf32>
      %35 = vector.shape_cast %34 : vector<256xf32> to vector<1x256xf32>
      %36 = arith.addf %33, %35 : vector<1x256xf32>
      %c0_23 = arith.constant 0 : index
      %c0_24 = arith.constant 0 : index
      %37 = vector.load %arg12[%c0_23, %c0_24] : memref<1x256xf32, #tpu.memory_space<vmem>>, vector<1x256xf32>
      tpu.vector_store %arg12[%c0_23, %c0_24], %36 {strides = array<i32>} : memref<1x256xf32, #tpu.memory_space<vmem>>, vector<1x256xf32>,
      %c0_25 = arith.constant 0 : index
      %c0_26 = arith.constant 0 : index
      %38 = vector.load %arg13[%c0_25, %c0_26] : memref<1x256xf32, #tpu.memory_space<vmem>>, vector<1x256xf32>
      %39 = arith.mulf %21, %21 : vector<8x256xf32>
      %cst_27 = arith.constant dense<0.000000e+00> : vector<256xf32>
      %40 = vector.multi_reduction <add>, %39, %cst_27 [0] : vector<8x256xf32> to vector<256xf32>
      %41 = vector.shape_cast %40 : vector<256xf32> to vector<1x256xf32>
      %42 = arith.addf %38, %41 : vector<1x256xf32>
      %c0_28 = arith.constant 0 : index
      %c0_29 = arith.constant 0 : index
      %43 = vector.load %arg13[%c0_28, %c0_29] : memref<1x256xf32, #tpu.memory_space<vmem>>, vector<1x256xf32>
      tpu.vector_store %arg13[%c0_28, %c0_29], %42 {strides = array<i32>} : memref<1x256xf32, #tpu.memory_space<vmem>>, vector<1x256xf32>,
    } else {
    }
    %c1_i32 = arith.constant 1 : i32
    %25 = arith.cmpi eq, %arg0, %c1_i32 : i32
    %c0_i32_16 = arith.constant 0 : i32
    %26 = arith.cmpi eq, %arg1, %c0_i32_16 : i32
    %27 = arith.andi %25, %26 : i1
    %28 = arith.extui %27 : i1 to i32
    %c0_i32_17 = arith.constant 0 : i32
    %29 = arith.cmpi ne, %28, %c0_i32_17 : i32
    scf.if %29 {
      %c0_20 = arith.constant 0 : index
      %c0_21 = arith.constant 0 : index
      %33 = vector.load %arg12[%c0_20, %c0_21] : memref<1x256xf32, #tpu.memory_space<vmem>>, vector<1x256xf32>
      %cst_22 = arith.constant 8.000000e+00 : f32
      %34 = vector.broadcast %cst_22 : f32 to vector<1x256xf32>
      %35 = arith.divf %33, %34 : vector<1x256xf32>
      %c0_23 = arith.constant 0 : index
      %c0_24 = arith.constant 0 : index
      %36 = vector.load %arg13[%c0_23, %c0_24] : memref<1x256xf32, #tpu.memory_space<vmem>>, vector<1x256xf32>
      %cst_25 = arith.constant 8.000000e+00 : f32
      %37 = vector.broadcast %cst_25 : f32 to vector<1x256xf32>
      %38 = arith.divf %36, %37 : vector<1x256xf32>
      %39 = arith.mulf %35, %35 : vector<1x256xf32>
      %40 = arith.subf %38, %39 : vector<1x256xf32>
      %cst_26 = arith.constant 0.000000e+00 : f32
      %41 = vector.broadcast %cst_26 : f32 to vector<1x256xf32>
      %42 = arith.maximumf %40, %41 : vector<1x256xf32>
      %c0_27 = arith.constant 0 : index
      %c0_28 = arith.constant 0 : index
      %43 = vector.load %arg7[%c0_27, %c0_28] : memref<1x256xf32, #tpu.memory_space<vmem>>, vector<1x256xf32>
      %cst_29 = arith.constant 9.99999974E-6 : f32
      %44 = vector.broadcast %cst_29 : f32 to vector<1x256xf32>
      %45 = arith.addf %42, %44 : vector<1x256xf32>
      %46 = math.rsqrt %45 : vector<1x256xf32>
      %47 = arith.mulf %43, %46 : vector<1x256xf32>
      %c0_30 = arith.constant 0 : index
      %c0_31 = arith.constant 0 : index
      %48 = vector.load %arg9[%c0_30, %c0_31] : memref<1x256xf32, #tpu.memory_space<vmem>>, vector<1x256xf32>
      %49 = arith.mulf %48, %47 : vector<1x256xf32>
      %c0_32 = arith.constant 0 : index
      %c0_33 = arith.constant 0 : index
      %50 = vector.load %arg14[%c0_32, %c0_33] : memref<1x256xf32, #tpu.memory_space<vmem>>, vector<1x256xf32>
      tpu.vector_store %arg14[%c0_32, %c0_33], %49 {strides = array<i32>} : memref<1x256xf32, #tpu.memory_space<vmem>>, vector<1x256xf32>,
      %c0_34 = arith.constant 0 : index
      %c0_35 = arith.constant 0 : index
      %51 = vector.load %arg10[%c0_34, %c0_35] : memref<1x1xf32, #tpu.memory_space<vmem>>, vector<1x1xf32>
      %c0_36 = arith.constant 0 : index
      %c0_37 = arith.constant 0 : index
      %52 = vector.load %arg8[%c0_36, %c0_37] : memref<1x256xf32, #tpu.memory_space<vmem>>, vector<1x256xf32>
      %53 = arith.mulf %35, %47 : vector<1x256xf32>
      %54 = arith.subf %52, %53 : vector<1x256xf32>
      %c0_38 = arith.constant 0 : index
      %c0_39 = arith.constant 0 : index
      %55 = vector.load %arg9[%c0_38, %c0_39] : memref<1x256xf32, #tpu.memory_space<vmem>>, vector<1x256xf32>
      %56 = arith.mulf %54, %55 : vector<1x256xf32>
      %cst_40 = arith.constant dense<0.000000e+00> : vector<1xf32>
      %57 = vector.multi_reduction <add>, %56, %cst_40 [1] : vector<1x256xf32> to vector<1xf32>
      %58 = vector.shape_cast %57 : vector<1xf32> to vector<1x1xf32>
      %59 = arith.addf %51, %58 : vector<1x1xf32>
      %c0_41 = arith.constant 0 : index
      %c0_42 = arith.constant 0 : index
      %60 = vector.load %arg15[%c0_41, %c0_42] : memref<1x1xf32, #tpu.memory_space<vmem>>, vector<1x1xf32>
      tpu.vector_store %arg15[%c0_41, %c0_42], %59 {strides = array<i32>} : memref<1x1xf32, #tpu.memory_space<vmem>>, vector<1x1xf32>,
    } else {
    }
    %c1_i32_18 = arith.constant 1 : i32
    %30 = arith.cmpi eq, %arg0, %c1_i32_18 : i32
    %31 = arith.extui %30 : i1 to i32
    %c0_i32_19 = arith.constant 0 : i32
    %32 = arith.cmpi ne, %31, %c0_i32_19 : i32
    scf.if %32 {
      %c0_20 = arith.constant 0 : index
      %c0_21 = arith.constant 0 : index
      %33 = vector.load %arg14[%c0_20, %c0_21] : memref<1x256xf32, #tpu.memory_space<vmem>>, vector<1x256xf32>
      %34 = vector.broadcast %33 : vector<1x256xf32> to vector<8x256xf32>
      %35 = arith.mulf %21, %34 : vector<8x256xf32>
      %cst_22 = arith.constant dense<0.000000e+00> : vector<8xf32>
      %36 = vector.multi_reduction <add>, %35, %cst_22 [1] : vector<8x256xf32> to vector<8xf32>
      %37 = vector.shape_cast %36 : vector<8xf32> to vector<8x1xf32>
      %c0_23 = arith.constant 0 : index
      %c0_24 = arith.constant 0 : index
      %38 = vector.load %arg15[%c0_23, %c0_24] : memref<1x1xf32, #tpu.memory_space<vmem>>, vector<1x1xf32>
      %39 = vector.broadcast %38 : vector<1x1xf32> to vector<8x1xf32>
      %40 = arith.addf %37, %39 : vector<8x1xf32>
      %41 = arith.negf %40 : vector<8x1xf32>
      %42 = math.exp %41 : vector<8x1xf32>
      %cst_25 = arith.constant 1.000000e+00 : f32
      %43 = vector.broadcast %cst_25 : f32 to vector<8x1xf32>
      %44 = arith.addf %43, %42 : vector<8x1xf32>
      %45 = arith.divf %43, %44 : vector<8x1xf32>
      %c0_26 = arith.constant 0 : index
      %c0_27 = arith.constant 0 : index
      %46 = vector.load %arg11[%c0_26, %c0_27] : memref<8x1xf32, #tpu.memory_space<vmem>>, vector<8x1xf32>
      tpu.vector_store %arg11[%c0_26, %c0_27], %45 {strides = array<i32>} : memref<8x1xf32, #tpu.memory_space<vmem>>, vector<8x1xf32>,
    } else {
    }
    return
  }
  func.func @transform_0(%arg0: i32, %arg1: i32) -> (i32, i32) {
    %c0_i32 = arith.constant 0 : i32
    %c0_i32_0 = arith.constant 0 : i32
    return %arg1, %c0_i32 : i32, i32
  }
  func.func @transform_1(%arg0: i32, %arg1: i32) -> (i32, i32) {
    %c0_i32 = arith.constant 0 : i32
    %c0_i32_0 = arith.constant 0 : i32
    %c0_i32_1 = arith.constant 0 : i32
    return %c0_i32, %c0_i32_0 : i32, i32
  }
  func.func @transform_2(%arg0: i32, %arg1: i32) -> (i32, i32) {
    %c0_i32 = arith.constant 0 : i32
    %c0_i32_0 = arith.constant 0 : i32
    %c0_i32_1 = arith.constant 0 : i32
    return %c0_i32, %c0_i32_0 : i32, i32
  }
  func.func @transform_3(%arg0: i32, %arg1: i32) -> (i32, i32) {
    %c0_i32 = arith.constant 0 : i32
    %c0_i32_0 = arith.constant 0 : i32
    %c0_i32_1 = arith.constant 0 : i32
    return %c0_i32, %c0_i32_0 : i32, i32
  }
  func.func @transform_4(%arg0: i32, %arg1: i32) -> (i32, i32) {
    %c0_i32 = arith.constant 0 : i32
    %c0_i32_0 = arith.constant 0 : i32
    %c0_i32_1 = arith.constant 0 : i32
    return %c0_i32, %c0_i32_0 : i32, i32
  }
  func.func @transform_5(%arg0: i32, %arg1: i32) -> (i32, i32) {
    %c0_i32 = arith.constant 0 : i32
    %c0_i32_0 = arith.constant 0 : i32
    %c0_i32_1 = arith.constant 0 : i32
    return %c0_i32, %c0_i32_0 : i32, i32
  }
  func.func @transform_6(%arg0: i32, %arg1: i32) -> (i32, i32) {
    %c0_i32 = arith.constant 0 : i32
    %c0_i32_0 = arith.constant 0 : i32
    %c0_i32_1 = arith.constant 0 : i32
    return %c0_i32, %c0_i32_0 : i32, i32
  }
  func.func @transform_7(%arg0: i32, %arg1: i32) -> (i32, i32) {
    %c0_i32 = arith.constant 0 : i32
    %c0_i32_0 = arith.constant 0 : i32
    %c0_i32_1 = arith.constant 0 : i32
    return %c0_i32, %c0_i32_0 : i32, i32
  }
  func.func @transform_8(%arg0: i32, %arg1: i32) -> (i32, i32) {
    %c0_i32 = arith.constant 0 : i32
    %c0_i32_0 = arith.constant 0 : i32
    %c0_i32_1 = arith.constant 0 : i32
    return %c0_i32, %c0_i32_0 : i32, i32
  }
  func.func @transform_9(%arg0: i32, %arg1: i32) -> (i32, i32) {
    %c0_i32 = arith.constant 0 : i32
    %c0_i32_0 = arith.constant 0 : i32
    return %arg1, %c0_i32 : i32, i32
  }
}

</mosaic_0001>

<bundles_post_ra>
// kernel: match_predictor.1
= control target key start
LH: loop header
LB: loop body
LE: loop exit
PB: predicated region body
PF: predicated region fallthrough
CT: control target
= control target key end

     0   :  { %s926_s11 = smov 0   ;;  %s928_s12 = smov 0   ;;  %s1040_s0 = inlined_call_operand.vmem [shape: f32[8,32], index: 0, kind: input, shape index: {}]   ;;  %s1041_s1 = inlined_call_operand.vmem [shape: bf16[32,64], index: 1, kind: input, shape index: {}]   ;;  %s1042_s2 = inlined_call_operand.vmem [shape: f32[1,64], index: 2, kind: input, shape index: {}]   ;;  %s1043_s3 = inlined_call_operand.vmem [shape: bf16[64,256], index: 3, kind: input, shape index: {}]   ;;  %s1044_s4 = inlined_call_operand.vmem [shape: f32[1,256], index: 4, kind: input, shape index: {}]   ;;  %s1045_s5 = inlined_call_operand.vmem [shape: f32[1,256], index: 5, kind: input, shape index: {}]   ;;  %s1046_s6 = inlined_call_operand.vmem [shape: f32[1,256], index: 6, kind: input, shape index: {}]   ;;  %s1047_s7 = inlined_call_operand.vmem [shape: f32[1,256], index: 7, kind: input, shape index: {}]   ;;  %s1048_s8 = inlined_call_operand.<no memory space> [shape: f32[1,1], index: 8, kind: input, shape index: {}]   ;;  %s1049_s9 = inlined_call_operand.vmem [shape: f32[8,1], index: 9, kind: output, shape index: {}]  }
   0x1   :  { %v14_v0 = vstv %s1048_s8  ;;  %s930_s13 = smov 0  }
   0x2   :  { %15 = vst [vmem:[#allocation6] sm:$0x1] %v14_v0 }
   0x3 LB: > { %s33_s8 = sadd.s32 1, %s862_s12  ;;  %p759_p0 = scmp.ge.s32.totalorder %s866_s13, 1  ;;  %s866_s13 = sphi %s930_s13, %s21_s13   ;;  %s862_s12 = sphi %s928_s12, %s1051_s12   ;;  %s858_s11 = sphi %s926_s11, %s1050_s11  }
   0x4   : > { %p35_p1 = scmp.ge.s32.totalorder %s33_s8, 2  ;;  %p300_p2 = scmp.lt.s32.totalorder %s866_s13, 3 }
   0x6   : > { %s1053_s8 = smov (%p35_p1, %s33_s8), 0  ;;  %p301_p3 = pnand %p759_p0, %p300_p2 }
   0x7   : > { %p343_p4 = scmp.eq.s32.totalorder (!%p301_p3), %s858_s11, 0 }
   0x8   : > { %304 = sbr.rel (%p301_p3) target bundleno = 852 (0x354), region = 56 }
   0xf   : > { %348 = sbr.rel (!%p343_p4) target bundleno = 22 (0x16), region = 60  ;;  %v349_v1 = vlaneseq (%p343_p4)  ;;  %v868_v2 = vmov (%p343_p4), 0.0  }
  0x11   : > { %vm351_vm0 = vcmp.lt.s32.totalorder (%p343_p4), %v349_v1, 256 }
  0x12   : > { %353 = vst.msk [vmem:[#allocation2] sm:$0x3] (%p343_p4), %vm351_vm0, %v868_v2  ;;  %354 = vst.msk [vmem:[#allocation3] sm:$0x3] (%p343_p4), %vm351_vm0, %v868_v2 }
  0x16 PF: > { %v824_v3 = vld [vmem:[%s1041_s1] sm:$0xff]   ;;  %v869_v4 = vmov 0.0   ;;  %v825_v5 = vld [vmem:[%s1041_s1 + $0x8] sm:$0xff]   ;;  %vm870_vm1 = vmmov 0   ;;  %v829_v9 = vld [vmem:[%s1043_s3 + $0x14] ss:$8 sps:$4 sm:$0xff]   ;;  %v436_v25 = vlaneseq }
  0x17   : > { %787 = vmatprep.subr.bf16.mxu0 %v869_v4  ;;  %791 = vmatprep.mubr.msk.bf16.mxu0 %vm870_vm1, %v869_v4  ;;  %v355_v6 = vld [vmem:[%s1040_s0] sm:$0xff]  ;;  %vm380_vm2 = vcmask 261120   ;;  %v831_v11 = vld [vmem:[%s1043_s3 + $0x10] ss:$8 sps:$4 sm:$0xff]   ;;  %v835_v14 = vld [vmem:[%s1043_s3 + $0x34] ss:$8 sps:$4 sm:$0xff]  }
  0x18   : > { %788 = vmatpush3.bf16.msra.mxu0 %v824_v3  ;;  %v826_v7 = vld [vmem:[%s1043_s3 + $0x4] ss:$8 sps:$4 sm:$0xff]   ;;  %v828_v8 = vld [vmem:[%s1043_s3] ss:$8 sps:$4 sm:$0xff]   ;;  %v356_v10 = vpack.c.bf16 %v355_v6, %v355_v6  ;;  %v837_v15 = vld [vmem:[%s1043_s3 + $0x30] ss:$8 sps:$4 sm:$0xff]  }
  0x19   : > { %789 = vmatprep.subr.bf16.mxu0 %v869_v4  ;;  %490 = vmatprep.subr.bf16.mxu1 %v826_v7  ;;  %v832_v12 = vld [vmem:[%s1043_s3 + $0x24] ss:$8 sps:$4 sm:$0xff]   ;;  %v834_v13 = vld [vmem:[%s1043_s3 + $0x20] ss:$8 sps:$4 sm:$0xff]   ;;  %v871_v16 = vmov 0   ;;  %vm486_vm3 = vcmask 523264  }
  0x1a   : > { %491 = vmatpush1.bf16.msra.mxu1 %v828_v8  ;;  %522 = vmatprep.mubr.bf16.mxu1 %v871_v16  ;;  %v761_v17 = vld [vmem:[%s1042_s2] ss:$0 sm:$0xff]  ;;  %v437_v26 = vshrl.u32 %v436_v25, 7  ;;  %p774_p5 = scmp.ne.s32.totalorder %s858_s11, 0 }
  0x1b   : > { %492 = vmatprep.subr.bf16.mxu1 %v829_v9  ;;  %v434_v28 = vld [vmem:[%s1044_s4] sm:$0x3]  ;;  %v872_v46 = vmov (!%p774_p5), 1966171168   ;;  %vm570_vm4 = vcmp.lt.s32.totalorder (!%p774_p5), %v436_v25, 256 }
  0x1c   : > { %790 = vmatpush3.bf16.msra.mxu0 %v825_v5  ;;  %v984_v27 = vsub.s32 0, %v437_v26  ;;  %v989_v29 = vsub.s32 1, %v437_v26  ;;  %v553_v47 = vunpack.c.l.s4 (!%p774_p5), %v872_v46  ;;  %v536_v8 = vld [vmem:[#allocation2] sm:$0x3] (!%p774_p5) }
  0x1e   : > { %493 = vmatpush1.bf16.msra.mxu1 %v831_v11  ;;  %v439_v30 = vrot.slane %v434_v28, %v984_v27  ;;  %v443_v31 = vrot.slane %v434_v28, %v989_v29  ;;  %v554_v56 = vunpack.c.0.s8 (!%p774_p5), %v553_v47 }
  0x1f   : > { %792 = vmatmul.mubr.msk.bf16.vlgmr.msra.gmra.mrb[0].mxu0 %vm380_vm2, %v356_v10  ;;  %494 = vmatprep.subr.bf16.mxu1 %v832_v12 }
  0x20   : > { %v557_v1 = vsub.s32 (!%p774_p5), %v554_v56, %v437_v26 }
  0x22   : > { %495 = vmatpush1.bf16.msra.mxu1 %v834_v13  ;;  %v573_v13 = vld [vmem:[#allocation3] sm:$0x3] (!%p774_p5) }
  0x23   : > { %496 = vmatprep.subr.bf16.mxu1 %v835_v14 }
  0x26   : > { %497 = vmatpush1.bf16.msra.mxu1 %v837_v15 }
  0xf2   : > { %v418_v18 = vpop.f32.mrb[0].mxu0 }
  0xf3   : > { %v419_v19 = vadd.f32 %v761_v17, %v418_v18  ;;  %v793_v20 = vpop.f32.mrb[1].mxu0 }
  0xf4   : > { %v421_v21 = vpop.f32.mrb[2].mxu0 }
  0xf5   : > { %v424_v22 = vmax.f32 %v419_v19, 0.0  ;;  %v794_v23 = vpop.f32.mrb[3].mxu0 }
  0xf7   : > { %v425_v24 = vpack.c.bf16 %v424_v22, %v424_v22 }
  0xf9   : > { %773 = vmatmul.mubr.msk.bf16.vlgmr.msra.gmra.mrb[0].mxu1 %vm486_vm3, %v425_v24 }
 0x1ca   : > { %535 = sbr.rel (%p774_p5) target bundleno = 489 (0x1e9), region = 64 }
 0x1cc   : > { %v524_v32 = vpop.f32.mrb[0].mxu1 }
 0x1cd   : > { %v525_v33 = vadd.f32 %v524_v32, %v439_v30  ;;  %v526_v34 = vpop.f32.mrb[1].mxu1 }
 0x1ce   : > { %v527_v35 = vadd.f32 %v526_v34, %v443_v31  ;;  %v528_v36 = vpop.f32.mrb[2].mxu1 }
 0x1cf   : > { %v993_v37 = vmax.f32 %v525_v33, 0.0  ;;  %v529_v38 = vpop.f32.mrb[3].mxu1 }
 0x1d0   : > { %v995_v39 = vmax.f32 %v527_v35, 0.0 }
 0x1d1   : > { %v537_v40 = vrot.slane %v993_v37, 4  ;;  %v574_v42 = vmul.f32 %v993_v37, %v993_v37 }
 0x1d2   : > { %v543_v41 = vrot.slane %v995_v39, 4  ;;  %v575_v43 = vmul.f32 %v995_v39, %v995_v39 }
 0x1d3   : > { %v538_v44 = vadd.f32 %v537_v40, %v993_v37  ;;  %v576_v48 = vrot.slane %v574_v42, 4 }
 0x1d4   : > { %v544_v45 = vadd.f32 %v543_v41, %v995_v39  ;;  %v582_v49 = vrot.slane %v575_v43, 4 }
 0x1d5   : > { %v539_v50 = vrot.slane %v538_v44, 2  ;;  %v577_v52 = vadd.f32 %v576_v48, %v574_v42 }
 0x1d6   : > { %v545_v51 = vrot.slane %v544_v45, 2  ;;  %v583_v53 = vadd.f32 %v582_v49, %v575_v43 }
 0x1d7   : > { %v540_v54 = vadd.f32 %v539_v50, %v538_v44  ;;  %v578_v57 = vrot.slane %v577_v52, 2 }
 0x1d8   : > { %v546_v55 = vadd.f32 %v545_v51, %v544_v45  ;;  %v584_v58 = vrot.slane %v583_v53, 2 }
 0x1d9   : > { %v541_v59 = vrot.slane %v540_v54, 1  ;;  %v579_v61 = vadd.f32 %v578_v57, %v577_v52 }
 0x1da   : > { %v547_v60 = vrot.slane %v546_v55, 1  ;;  %v585_v62 = vadd.f32 %v584_v58, %v583_v53 }
 0x1db   : > { %v542_v63 = vadd.f32 %v541_v59, %v540_v54  ;;  %v580_v2 = vrot.slane %v579_v61, 1 }
 0x1dc   : > { %v548_v0 = vadd.f32 %v547_v60, %v546_v55  ;;  %v586_v3 = vrot.slane %v585_v62, 1 }
 0x1dd   : > { %v581_v5 = vadd.f32 %v580_v2, %v579_v61 }
 0x1de   : > { %v551_v4 = vcombine.low %v542_v63, %v548_v0  ;;  %v587_v6 = vadd.f32 %v586_v3, %v585_v62 }
 0x1e0   : > { %v558_v7 = vrot.slane %v551_v4, %v557_v1  ;;  %v590_v9 = vcombine.low %v581_v5, %v587_v6 }
 0x1e2   : > { %v565_v10 = vrot.slane %v558_v7, %v557_v1  ;;  %v597_v11 = vrot.slane %v590_v9, %v557_v1 }
 0x1e4   : > { %v567_v12 = vadd.f32 %v565_v10, %v536_v8  ;;  %v604_v14 = vrot.slane %v597_v11, %v557_v1 }
 0x1e6   : > { %572 = vst.msk [vmem:[#allocation2] sm:$0x3] %vm570_vm4, %v567_v12  ;;  %v606_v15 = vadd.f32 %v604_v14, %v573_v13 }
 0x1e8   : > { %607 = vst.msk [vmem:[#allocation3] sm:$0x3] %vm570_vm4, %v606_v15 }
 0x1e9 PF: > { %p608_p6 = scmp.eq.s32.totalorder %s858_s11, 1 }
 0x1ea   : > { %v621_v24 = vld [vmem:[%s1045_s5] sm:$0x3] (%p608_p6)  ;;  %vm629_vm5 = vcmp.lt.s32.totalorder (%p608_p6), %v436_v25, 256  ;;  %vm649_vm6 = vcmask (%p608_p6), 1040384   ;;  %v632_v43 = vld [vmem:[#allocation6] sm:$0x1] (%p608_p6) }
 0x1eb   : > { %612 = sbr.rel (!%p608_p6) target bundleno = 673 (0x2a1), region = 68  ;;  %v625_v28 = vld [vmem:[%s1047_s7] sm:$0x3] (%p608_p6)  ;;  %vm656_vm7 = vcmask (%p608_p6), 0  }
 0x1ec   : > { %v633_v31 = vld [vmem:[%s1046_s6] sm:$0x3] (%p608_p6) }
 0x1ed   : > { %v613_v16 = vld [vmem:[#allocation2] sm:$0x3] (%p608_p6) }
 0x1ee   : > { %v615_v18 = vmul.f32 (%p608_p6), 0.125, %v613_v16  ;;  %v636_v34 = vld [vmem:[%s1047_s7] sm:$0x3] (%p608_p6) }
 0x1ef   : > { %v616_v17 = vld [vmem:[#allocation3] sm:$0x3] (%p608_p6) }
 0x1f0   : > { %v617_v19 = vmul.f32 (%p608_p6), 0.125, %v616_v17  ;;  %v618_v20 = vmul.f32 (%p608_p6), %v615_v18, %v615_v18 }
 0x1f2   : > { %v619_v21 = vsub.f32 %v617_v19, %v618_v20 }
 0x1f4   : > { %v620_v22 = vmax.f32 %v619_v21, 0.0 }
 0x1f6   : > { %v622_v23 = vadd.f32 1e-05, %v620_v22 }
 0x1f8   : > { %838 = vrsqrt.f32 %v622_v23 }
 0x202   : > { %v839_v26 = vpop.eup %838 }
 0x203   : > { %v624_v30 = vmul.f32 %v839_v26, %v621_v24 }
 0x205   : > { %v626_v32 = vmul.f32 %v625_v28, %v624_v30  ;;  %v634_v33 = vmul.f32 %v624_v30, %v615_v18 }
 0x207   : > { %631 = vst.msk [vmem:[#allocation4] sm:$0x3] %vm629_vm5, %v626_v32  ;;  %v635_v35 = vsub.f32 %v633_v31, %v634_v33 }
 0x209   : > { %v637_v36 = vmul.f32 %v636_v34, %v635_v35 }
 0x20b   : > { %v642_v38 = vrot.slane %v637_v36, %v984_v27  ;;  %v646_v40 = vrot.slane %v637_v36, %v989_v29 }
 0x20d   : > { %v650_v41 = vsel %vm649_vm6, %v642_v38, 0.0  ;;  %v651_v25 = vsel %vm649_vm6, %v646_v40, 0.0 }
 0x20e   : > { %v652_v42 = vadd.f32 %v651_v25, %v650_v41 }
 0x210   : > { %653 = vadd.xlane.f32.xlu0 %v652_v42 }
 0x29d   : > { %v654_v44 = vpop.xlane.xlu0 %653 }
 0x29e   : > { %v655_v45 = vadd.f32 %v654_v44, %v632_v43 }
 0x2a0   : > { %657 = vst.msk [vmem:[#allocation5] sm:$0x1] %vm656_vm7, %v655_v45 }
 0x2a1 PF: > { %p776_p7 = scmp.ne.s32.totalorder %s858_s11, 1 }
 0x2a2   : > { %v661_v46 = vld [vmem:[#allocation4] sm:$0x3] (!%p776_p7)  ;;  %vm692_vm8 = vcmask (!%p776_p7), 7168  }
 0x2a3   : > { %660 = sbr.rel (%p776_p7) target bundleno = 852 (0x354), region = 72  ;;  %v666_v47 = vrot.slane (!%p776_p7), %v661_v46, %v984_v27  ;;  %v670_v48 = vrot.slane (!%p776_p7), %v661_v46, %v989_v29 }
 0x2a5   : > { %v673_v49 = vmul.f32 (!%p776_p7), %v666_v47, %v993_v37  ;;  %v674_v50 = vmul.f32 (!%p776_p7), %v670_v48, %v995_v39 }
 0x2a7   : > { %v675_v51 = vadd.f32 (!%p776_p7), %v674_v50, %v673_v49  ;;  %v777_v52 = vld [vmem:[#allocation5] ss:$0 sm:$0xff] (!%p776_p7) }
 0x2a9   : > { %676 = vadd.xlane.f32.xlu0 (!%p776_p7), %v675_v51 }
 0x336   : > { %v677_v53 = vpop.xlane.xlu0 %676 }
 0x337   : > { %v685_v54 = vadd.f32 %v777_v52, %v677_v53 }
 0x339   : > { %v778_v55 = vmul.f32 -1.442695, %v685_v54 }
 0x33b   : > { %840 = vpow2.f32 %v778_v55 }
 0x345   : > { %v841_v56 = vpop.eup %840 }
 0x346   : > { %v689_v57 = vadd.f32 1.0, %v841_v56 }
 0x348   : > { %842 = vrcp.f32 %v689_v57 }
 0x352   : > { %v843_v58 = vpop.eup %842 }
 0x353   : > { %693 = vst.msk [vmem:[%s1049_s9] sm:$0xff] %vm692_vm8, %v843_v58 }
 0x354 PF: > { %s21_s13 = sadd.s32 1, %s866_s13   ;;  %s1050_s11 = smov %s862_s12 }
 0x355   : > { %p18_p8 = scmp.ge.s32.totalorder %s21_s13, 4   ;;  %s1051_s12 = smov %s1053_s8 }
 0x357   :  { %20 = sbr.rel (!%p18_p8) target bundleno = 3 (0x3), region = 102 }

</bundles_post_ra>
